<compile_context>
chip_gen: v6e
topology: v6e:2x2x1
jax: 0.10.0
libtpu: 0.0.40
codegen_flags: <defaults>
</compile_context>

<pallas_src>
import jax
import jax.numpy as jnp
from jax.experimental import pallas as pl
from jax.experimental.pallas import tpu as pltpu


def _round_up(a, m):
    return ((a + m - 1) // m) * m


def folded_mlp_kernel(x_ref, w_ref, b_ref, o_ref):
    """One grid step.

    x_ref: [TB, D] VMEM  batch tile of embeddings
    w_ref: [1, D]  VMEM  fully folded weight row
    b_ref: [1, 1]  SMEM  fully folded bias (scalar)
    o_ref: [1, TB] VMEM  lane-dense output slab (batch on the lane axis)
    """
    # Contract both operands on their last (D) axis -> [1, TB].  Batch lands
    # on the lane axis, so the store is an unmasked full-lane vst.
    y = jax.lax.dot_general(
        w_ref[...], x_ref[...],
        dimension_numbers=(((1,), (1,)), ((), ())),
        preferred_element_type=jnp.float32,
    )
    o_ref[...] = y + b_ref[0, 0]


def fold_params(params):
    """Collapse Linear(D,1024)->Linear(1024,128)->Linear(128,64)->Linear(64,16)
    ->Linear(16,1) (Dropout = identity at eval) into y = x @ W_fold + b_fold.

    Right-associated so every intermediate stays a column vector (better fp32
    accuracy, zero runtime cost).  Weights are stored [in, out].
    Returns (w_row [1, D], b_fold [1, 1])."""
    (w1, b1), (w2, b2), (w3, b3), (w4, b4), (w5, b5) = (
        params["l1"], params["l2"], params["l3"], params["l4"], params["l5"])
    hi = jax.lax.Precision.HIGHEST
    dot = lambda a, b: jnp.dot(a, b, precision=hi)
    w45 = dot(w4, w5)            # [64, 1]
    w345 = dot(w3, w45)          # [128, 1]
    w2345 = dot(w2, w345)        # [1024, 1]
    w_fold = dot(w1, w2345)      # [D, 1]
    b_fold = (dot(b1, w2345) + dot(b2, w345) + dot(b3, w45)
              + dot(b4, w5) + b5)                     # [1, 1]
    return w_fold.T, b_fold                           # ([1, D], [1, 1])


def _pick_batch_tile(B, batch_tile):
    cap = max(128, (int(batch_tile) // 128) * 128)
    if B <= 128:
        return 128                       # too small to split: grid=(1,)
    # Keep >= 2 grid steps so both v7x TensorCores share the HBM stream; a
    # ~0.35us extra step is far cheaper than idling half the chip's bandwidth.
    half = _round_up(pl.cdiv(B, 2), 128)
    return min(cap, half)


def classifier_forward(x, w_row, b_fold, *, batch_tile=1024):
    """x: [B, D] float32.  w_row: [1, D], b_fold: [1, 1] from fold_params."""
    B, D = x.shape
    if B == 0:
        return jnp.zeros((0, 1), jnp.float32)

    bt = _pick_batch_tile(B, batch_tile)
    b_lanes = _round_up(B, 128)          # lane-dense output slab width
    grid = (pl.cdiv(B, bt),)             # ragged last tile: Pallas clips DMAs

    # Raise the scoped-VMEM limit only if the caller requests tiles big enough
    # to exceed v5e's 16 MiB default (bt=1024 @ D=768 f32 does not).
    x_tile_bytes = bt * D * x.dtype.itemsize
    vmem_limit = None
    if 2 * x_tile_bytes + (2 << 20) > (16 << 20):
        vmem_limit = min(2 * x_tile_bytes + (8 << 20), 100 << 20)

    out = pl.pallas_call(
        folded_mlp_kernel,
        out_shape=jax.ShapeDtypeStruct((1, b_lanes), jnp.float32),
        grid=grid,
        in_specs=[
            pl.BlockSpec((bt, D), lambda i: (i, 0)),             # x batch tile
            pl.BlockSpec((1, D), lambda i: (0, 0)),              # folded weight row
            pl.BlockSpec(memory_space=pltpu.MemorySpace.SMEM),   # scalar bias
        ],
        out_specs=pl.BlockSpec((1, bt), lambda i: (0, i)),       # lane-dense slab
        compiler_params=pltpu.CompilerParams(
            dimension_semantics=("parallel",),
            vmem_limit_bytes=vmem_limit),
    )(x, w_row, b_fold)

    # Lanes in [B, b_lanes) of the last tile hold garbage (clipped input DMA);
    # slice them off before anything downstream looks at the slab.
    return out[0, :B].reshape(B, 1)


def init_params(key, input_size):
    """Mimics nn.Linear's U(-1/sqrt(fan_in), 1/sqrt(fan_in)) init.
    Weights are stored transposed ([in, out]) relative to PyTorch."""
    sizes = [(input_size, 1024), (1024, 128), (128, 64), (64, 16), (16, 1)]
    params = {}
    for idx, (fan_in, fan_out) in enumerate(sizes, start=1):
        key, kw, kb = jax.random.split(key, 3)
        bound = 1.0 / jnp.sqrt(jnp.float32(fan_in))
        w = jax.random.uniform(kw, (fan_in, fan_out), jnp.float32,
                               minval=-bound, maxval=bound)
        b = jax.random.uniform(kb, (1, fan_out), jnp.float32,
                               minval=-bound, maxval=bound)
        params[f"l{idx}"] = (w, b)
    return params


def classifier_ref(x, params):
    """Pure-JAX layer-by-layer reference (eval mode), full-f32 matmuls."""
    h = x
    for name in ("l1", "l2", "l3", "l4", "l5"):
        w, b = params[name]
        h = jnp.dot(h, w, precision=jax.lax.Precision.HIGHEST) + b
    return h


if __name__ == "__main__":
    key = jax.random.PRNGKey(0)
    key, kx, kp = jax.random.split(key, 3)

    # input_size=768 (CLIP ViT-L/14 embedding used by this predictor).
    # B=300 exercises the ragged last tile (no pad) and a 2-step parallel grid.
    B, D = 300, 768
    x = jax.random.normal(kx, (B, D), dtype=jnp.float32)
    params = init_params(kp, D)

    w_row, b_fold = fold_params(params)          # host-side one-time fold

    out = classifier_forward(x, w_row, b_fold)
    out = jax.block_until_ready(out)

    ref = classifier_ref(x, params)
    assert out.shape == (B, 1), out.shape
    max_err = float(jnp.max(jnp.abs(out - ref)))
    # Tolerance covers fold reassociation + possible reduced-precision MXU
    # passes for f32 matmuls inside the kernel.
    assert jnp.allclose(out, ref, atol=5e-3, rtol=1e-2), max_err

    print("KERNEL_OK")
</pallas_src>

<mosaic_0001>
module attributes {stable_mosaic.version = 11 : i64} {
  func.func @folded_mlp_kernel(%arg0: i32, %arg1: memref<256x768xf32, #tpu.memory_space<vmem>>, %arg2: memref<1x768xf32, #tpu.memory_space<vmem>>, %arg3: memref<1x1xf32, #tpu.memory_space<smem>>, %arg4: memref<1x256xf32, #tpu.memory_space<vmem>>) attributes {dimension_semantics = [#tpu.dimension_semantics<parallel>], iteration_bounds = array<i64: 2>, scalar_prefetch = 0 : i64, scratch_operands = 0 : i64, tpu.core_type = #tpu.core_type<tc>, window_params = [{transform_indices = @transform_0, window_bounds = array<i64: 256, 768>}, {pipeline_mode = #tpu.pipeline_mode<synchronous>, transform_indices = @transform_1, window_bounds = array<i64: 1, 768>}, {transform_indices = @transform_2, window_bounds = array<i64: 1, 1>}, {transform_indices = @transform_3, window_bounds = array<i64: 1, 256>}]} {
    %c0 = arith.constant 0 : index
    %c0_0 = arith.constant 0 : index
    %0 = vector.load %arg2[%c0, %c0_0] : memref<1x768xf32, #tpu.memory_space<vmem>>, vector<1x768xf32>
    %c0_1 = arith.constant 0 : index
    %c0_2 = arith.constant 0 : index
    %1 = vector.load %arg1[%c0_1, %c0_2] : memref<256x768xf32, #tpu.memory_space<vmem>>, vector<256x768xf32>
    %cst = arith.constant dense<0.000000e+00> : vector<1x256xf32>
    %2 = tpu.matmul %0, %1, %cst {dimension_numbers = #tpu.dot_dimension_numbers<[1], [1], [0], [0], [0, 0, 1, 0], [], []>} : vector<1x768xf32>, vector<256x768xf32>, vector<1x256xf32> -> vector<1x256xf32>
    %c0_3 = arith.constant 0 : index
    %c0_4 = arith.constant 0 : index
    %3 = memref.load %arg3[%c0_3, %c0_4] : memref<1x1xf32, #tpu.memory_space<smem>>
    %4 = vector.broadcast %3 : f32 to vector<1x256xf32>
    %5 = arith.addf %2, %4 : vector<1x256xf32>
    %c0_5 = arith.constant 0 : index
    %c0_6 = arith.constant 0 : index
    %6 = vector.load %arg4[%c0_5, %c0_6] : memref<1x256xf32, #tpu.memory_space<vmem>>, vector<1x256xf32>
    tpu.vector_store %arg4[%c0_5, %c0_6], %5 {strides = array<i32>} : memref<1x256xf32, #tpu.memory_space<vmem>>, vector<1x256xf32>,
    return
  }
  func.func @transform_0(%arg0: i32) -> (i32, i32) {
    %c0_i32 = arith.constant 0 : i32
    %c0_i32_0 = arith.constant 0 : i32
    return %arg0, %c0_i32 : i32, i32
  }
  func.func @transform_1(%arg0: i32) -> (i32, i32) {
    %c0_i32 = arith.constant 0 : i32
    %c0_i32_0 = arith.constant 0 : i32
    %c0_i32_1 = arith.constant 0 : i32
    return %c0_i32, %c0_i32_0 : i32, i32
  }
  func.func @transform_2(%arg0: i32) -> (i32, i32) {
    %c0_i32 = arith.constant 0 : i32
    %c0_i32_0 = arith.constant 0 : i32
    %c0_i32_1 = arith.constant 0 : i32
    return %c0_i32, %c0_i32_0 : i32, i32
  }
  func.func @transform_3(%arg0: i32) -> (i32, i32) {
    %c0_i32 = arith.constant 0 : i32
    %c0_i32_0 = arith.constant 0 : i32
    return %c0_i32, %arg0 : i32, i32
  }
}

</mosaic_0001>

<bundles_post_ra>
// kernel: tpu_custom_call.1
= control target key start
LH: loop header
LB: loop body
LE: loop exit
PB: predicated region body
PF: predicated region fallthrough
CT: control target
= control target key end

     0   :  { %s1408_s0 = inlined_call_operand.hbm [shape: f32[300,768], index: 0, kind: input, shape index: {}]   ;;  %s1409_s1 = inlined_call_operand.hbm [shape: f32[1,768], index: 1, kind: input, shape index: {}]   ;;  %s1410_s2 = inlined_call_operand.<no memory space> [shape: f32[1,1], index: 2, kind: input, shape index: {}]   ;;  %s1411_s3 = inlined_call_operand.hbm [shape: f32[1,384], index: 3, kind: output, shape index: {}]  }
   0x1   :  { %8 = sst [smem:[#allocation2]] %s1410_s2 }
   0x2   :  { %9 = vsyncpa [#allocation4], 0 }
   0x3   :  { %11 = vsyncpa [#allocation4 + $0x1], 0 }
   0x4   :  { %12 = vsyncpa [#allocation7], 0 }
   0x5   :  { %13 = vsyncpa [#allocation5], 0 }
   0x6   :  { %15 = vsyncpa [#allocation5 + $0x1], 0  ;;  %s1013_s14 = smov 0   ;;  %s1015_s15 = smov 0  }
   0x7   :  { %s1017_s16 = smov 0   ;;  %s1019_s17 = smov 0  }
   0x8 LB: > { %s1034_s2 = sadd.s32 4294967295, %s982_s17   ;;  %s784_s18 = sadd.s32 4294967294, %s982_s17   ;;  %s982_s17 = sphi %s1019_s17, %s1426_s17   ;;  %s978_s16 = sphi %s1017_s16, %s1425_s16   ;;  %s974_s15 = sphi %s1015_s15, %s1424_s15   ;;  %s970_s14 = sphi %s1013_s14, %s1423_s14  }
   0x9   : > { %s1038_s19 = sadd.s32 1, %s982_s17   ;;  %s28_s20 = sadd.s32 1, %s978_s16 }
   0xa   : > { %s25_s21 = ssub.s32 %s982_s17, %s1038_s19  ;;  %p35_p0 = scmp.ne.s32.totalorder %s978_s16, %s974_s15 }
   0xb   : > { %p26_p1 = scmp.eq.s32.totalorder %s25_s21, 0  ;;  %p36_p2 = scmp.eq.s32.totalorder %s982_s17, 0 }
   0xc   : > { %p41_p3 = scmp.ne.s32.totalorder %s974_s15, %s970_s14  ;;  %p42_p4 = scmp.eq.s32.totalorder %s1034_s2, 0 }
   0xd   : > { %s1050_s22 = scalar_select %p26_p1, %s978_s16, %s28_s20  }
   0xe   : > { %p1052_p5 = por %p36_p2, %p35_p0  ;;  %p1058_p6 = por %p42_p4, %p41_p3 }
   0xf   : > { %p107_p7 = scmp.eq.s32.totalorder %s1034_s2, 1  ;;  %p113_p8 = scmp.eq.s32.totalorder %s784_s18, 1 }
  0x10   : > { %s1415_s24 = scalar_select %p1058_p6, 1, 0 }
  0x11   : > { %p785_p9 = scmp.ge.s32.totalorder %s982_s17, 1  ;;  %p120_p10 = scmp.lt.s32.totalorder %s982_s17, 3 }
  0x12   : > { %p1065_p11 = por %p107_p7, %p35_p0  ;;  %p1069_p12 = por %p113_p8, %p41_p3 }
  0x13   : > { %p1073_p13 = pnand %p785_p9, %p120_p10  ;;  %s984_s28 = smov [#allocation6]  }
  0x14   : > { %s1416_s25 = scalar_select %p1065_p11, 1, 0 }
  0x15   : > { %s1417_s26 = scalar_select %p1069_p12, 1, 0 }
  0x16   : > { %p815_p1 = pneg %p1073_p13  ;;  %s133_s29 = sshll.u32 %s984_s28, 4  ;;  %s134_s29 = int_to_ptr.vmem [resolvable:$true] %s133_s29 }
  0x17   : > { %s873_s30 = scalar_lea.vmem %s134_s29, 96  ;;  %p881_p8 = scmp.lt.s32.totalorder %s134_s29, %s134_s29 }
  0x18   : > { %p816_p2 = pnand %p815_p1, %p42_p4  ;;  %p874_p7 = scmp.ne.s32.totalorder %s134_s29, %s873_s30 }
  0x19   : > { %p882_p6 = scmp.lt.s32.totalorder %s873_s30, %s873_s30 }
  0x1a   : > { %p864_p0 = pneg %p816_p2 }
  0x1b   : > { %p883_p12 = por %p882_p6, %p881_p8 }
  0x1c   : > { %p876_p11 = pnand %p874_p7, %p864_p0 }
  0x1e   : > { %p877_p3 = pneg %p876_p11 }
  0x20   : > { %p884_p9 = pnand %p883_p12, %p877_p3 }
  0x22   : > { %887 = shalt.err (!%p884_p9)
}
  0x23   : > { %818 = dma.hbm_to_vmem [thread:$0]  (!%p816_p2), %s1409_s1, 96, %s134_s29, [#allocation7]  }
  0x24   : > { %p1413_p10 = scmp.ge.s32.totalorder %s982_s17, 2 }
  0x26   : > { %143 = sbr.rel (%p1413_p10) target bundleno = 77 (0x4d), region = 24 }
  0x2b   : > { %146 = sbr.rel (!%p1052_p5) target bundleno = 77 (0x4d), region = 28  ;;  %s147_s6 = sand.u32 (%p1052_p5), 1, %s978_s16  }
  0x2c   : > { %s788_s7 = sshll.u32 (%p1052_p5), %s982_s17, 5  ;;  %s806_s8 = smul.u32 (%p1052_p5), 1536, %s147_s6 }
  0x2d   : > { %s153_s9 = ssub.s32 (%p1052_p5), 38, %s788_s7  ;;  %s1094_s12 = scalar_lea.sflag (%p1052_p5), [#allocation4], %s147_s6 }
  0x2e   : > { %p154_p6 = scmp.lt.s32.totalorder (%p1052_p5), %s153_s9, 32  ;;  %s151_s13 = scalar_lea.vmem (%p1052_p5), [#allocation3], %s806_s8 }
  0x30   : > { %s1428_s9 = smov (!%p154_p6, %s153_s9), 32 }
  0x31   : > { %s1091_s10 = smul.u32 768, %s1428_s9 }
  0x33   : > { %s159_s11 = ssub.s32 24576, %s1091_s10 }
  0x34   : > { %160 = vsyncadd %s1094_s12, %s159_s11  ;;  %p791_p5 = scmp.ne.s32.totalorder %s1091_s10, 0  ;;  %s807_s18 = smul.u32 24576, %s982_s17 }
  0x35   : > { %s166_s20 = sshll.u32 %s151_s13, 4  ;;  %s892_s5 = scalar_lea.hbm %s1408_s0, 29184  ;;  %s1104_s20 = int_to_ptr.vmem [resolvable:$true] %s166_s20 }
  0x36   : > { %s1102_s28 = scalar_lea.hbm %s1408_s0, %s807_s18 }
  0x37   : > { %s888_s29 = scalar_lea.hbm %s1102_s28, %s1091_s10  ;;  %p893_p2 = scmp.lt.s32.totalorder %s1102_s28, %s1408_s0 }
  0x38   : > { %p889_p11 = scmp.ne.s32.totalorder %s1102_s28, %s888_s29  ;;  %p894_p0 = scmp.lt.s32.totalorder %s892_s5, %s888_s29 }
  0x3a   : > { %p890_p12 = pnand %p889_p11, %p791_p5  ;;  %p895_p7 = por %p894_p0, %p893_p2 }
  0x3c   : > { %p891_p1 = pneg %p890_p12 }
  0x3e   : > { %p896_p3 = pnand %p895_p7, %p891_p1 }
  0x40   : > { %899 = shalt.err (!%p896_p3)
}
  0x41   : > { %s900_s8 = scalar_lea.vmem %s1104_s20, %s1091_s10  ;;  %s985_s9 = smov [#allocation3]  }
  0x42   : > { %p901_p8 = scmp.ne.s32.totalorder %s1104_s20, %s900_s8  ;;  %s904_s11 = sshll.u32 %s985_s9, 4  ;;  %s905_s11 = int_to_ptr.vmem [resolvable:$false] %s904_s11 }
  0x43   : > { %s906_s13 = scalar_lea.vmem %s905_s11, 49152  ;;  %p907_p11 = scmp.lt.s32.totalorder %s1104_s20, %s905_s11 }
  0x44   : > { %p902_p9 = pnand %p901_p8, %p791_p5  ;;  %p908_p12 = scmp.lt.s32.totalorder %s906_s13, %s900_s8 }
  0x46   : > { %p903_p6 = pneg %p902_p9  ;;  %p909_p10 = por %p908_p12, %p907_p11 }
  0x48   : > { %p910_p2 = pnand %p909_p10, %p903_p6 }
  0x4a   : > { %913 = shalt.err (!%p910_p2)
}
  0x4b   : > { %s986_s18 = smov 768   ;;  %s987_s21 = smov 48  }
  0x4c   : > { %172 = dma.hbm_to_vmem [thread:$0]  (%p791_p5), %s1102_s28, %s1091_s10, %s1104_s20, %s1094_s12, %s986_s18, %s986_s18, %s987_s21  }
  0x4d PF: > { %178 = sbr.rel (%p1073_p13) target bundleno = 572 (0x23c), region = 32  ;;  %s1133_s23 = sand.u32 (!%p1073_p13), 1, %s974_s15  }
  0x4e   : > { %s808_s29 = smul.u32 (!%p1073_p13), 1536, %s1133_s23  ;;  %s181_s30 = scalar_lea.sflag (!%p1073_p13), [#allocation4], %s1133_s23 }
  0x4f   : > { %p1419_p10 = scmp.ne.s32.totalorder (!%p1073_p13), %s1415_s24, 0 }
  0x50   : > { %s1137_s4 = scalar_lea.vmem (!%p1073_p13), [#allocation3], %s808_s29 }
  0x52   : > { %957 = dma.done.wait (%p1419_p10), %s181_s30, 24576  }
  0x53   : > { %959 = vsyncadd (%p1419_p10), %s181_s30, 4294942720 }
  0x54   : > { %961 = dma.done.wait (%p42_p4), [#allocation7], 96  }
  0x55   : > { %963 = vsyncadd (%p42_p4), [#allocation7], 4294967200  ;;  %v314_v0 = vld [vmem:[%s1137_s4 + $0x2d8] sm:$0xff]  ;;  %v313_v1 = vld [vmem:[%s1137_s4 + $0x2d0] sm:$0xff]  ;;  %v418_v36 = vlaneseq  ;;  %s415_s24 = sld [smem:[#allocation2]]  ;;  %s797_s27 = sshll.u32 %s1133_s23, 1 }
  0x56   : > { %v316_v2 = vld [vmem:[%s1137_s4 + $0x2e8] sm:$0xff]  ;;  %448 = vmatprep.subr.mxu0 %v314_v0  ;;  %v315_v3 = vld [vmem:[%s1137_s4 + $0x2e0] sm:$0xff]  ;;  %v310_v5 = vld [vmem:[%s1137_s4 + $0x2b8] sm:$0xff]  ;;  %s210_s10 = scalar_lea.vmem [#allocation8], %s797_s27  ;;  %s685_s12 = scalar_lea.sflag [#allocation5], %s1133_s23 }
  0x57   : > { %519 = vmatprep.subr.mxu1 %v316_v2  ;;  %v308_v4 = vld [vmem:[%s1137_s4 + $0x2a8] sm:$0xff]  ;;  %449 = vmatpush1.xpose.msra.mxu0 %v313_v1  ;;  %v307_v6 = vld [vmem:[%s1137_s4 + $0x2a0] sm:$0xff]  ;;  %v309_v7 = vld [vmem:[%s1137_s4 + $0x2b0] sm:$0xff]  ;;  %v1188_v41 = vshrl.u32 %v418_v36, 7  ;;  %vm681_vm0 = vcmp.lt.s32.totalorder %v418_v36, 256  ;;  %p1420_p4 = scmp.ne.s32.totalorder %s1416_s25, 0 }
  0x58   : > { %520 = vmatpush1.xpose.msra.mxu1 %v315_v3  ;;  %450 = vmatprep.subr.mxu0 %v308_v4  ;;  %v302_v8 = vld [vmem:[%s1137_s4 + $0x278] sm:$0xff]  ;;  %v304_v9 = vld [vmem:[%s1137_s4 + $0x288] sm:$0xff]  ;;  %v301_v10 = vld [vmem:[%s1137_s4 + $0x270] sm:$0xff]  ;;  %s799_s20 = sshll.u32 (%p1420_p4), %s1034_s2, 1 }
  0x59   : > { %521 = vmatprep.subr.mxu1 %v310_v5  ;;  %v303_v11 = vld [vmem:[%s1137_s4 + $0x280] sm:$0xff]  ;;  %v296_v12 = vld [vmem:[%s1137_s4 + $0x248] sm:$0xff]  ;;  %v298_v13 = vld [vmem:[%s1137_s4 + $0x258] sm:$0xff]  ;;  %v424_v46 = vsub.s32 1, %v1188_v41  ;;  %v432_v47 = vsub.s32 3, %v1188_v41  ;;  %s693_s28 = ssub.s32 (%p1420_p4), 3, %s799_s20 }
  0x5a   : > { %v295_v14 = vld [vmem:[%s1137_s4 + $0x240] sm:$0xff]  ;;  %v297_v15 = vld [vmem:[%s1137_s4 + $0x250] sm:$0xff]  ;;  %v290_v16 = vld [vmem:[%s1137_s4 + $0x218] sm:$0xff]  ;;  %p694_p13 = scmp.lt.s32.totalorder (%p1420_p4), %s693_s28, 2 }
  0x5b   : > { %451 = vmatpush1.xpose.msra.mxu0 %v307_v6  ;;  %v292_v17 = vld [vmem:[%s1137_s4 + $0x228] sm:$0xff]  ;;  %v289_v18 = vld [vmem:[%s1137_s4 + $0x210] sm:$0xff]  ;;  %v291_v19 = vld [vmem:[%s1137_s4 + $0x220] sm:$0xff] }
  0x5c   : > { %522 = vmatpush1.xpose.msra.mxu1 %v309_v7  ;;  %452 = vmatprep.subr.mxu0 %v302_v8  ;;  %v284_v20 = vld [vmem:[%s1137_s4 + $0x1e8] sm:$0xff]  ;;  %v286_v21 = vld [vmem:[%s1137_s4 + $0x1f8] sm:$0xff]  ;;  %v283_v22 = vld [vmem:[%s1137_s4 + $0x1e0] sm:$0xff] }
  0x5d   : > { %523 = vmatprep.subr.mxu1 %v304_v9  ;;  %v285_v23 = vld [vmem:[%s1137_s4 + $0x1f0] sm:$0xff]  ;;  %v278_v24 = vld [vmem:[%s1137_s4 + $0x1b8] sm:$0xff]  ;;  %v280_v25 = vld [vmem:[%s1137_s4 + $0x1c8] sm:$0xff] }
  0x5e   : > { %v277_v26 = vld [vmem:[%s1137_s4 + $0x1b0] sm:$0xff]  ;;  %v279_v27 = vld [vmem:[%s1137_s4 + $0x1c0] sm:$0xff]  ;;  %v272_v28 = vld [vmem:[%s1137_s4 + $0x188] sm:$0xff] }
  0x5f   : > { %453 = vmatpush1.xpose.msra.mxu0 %v301_v10  ;;  %v274_v29 = vld [vmem:[%s1137_s4 + $0x198] sm:$0xff]  ;;  %v271_v30 = vld [vmem:[%s1137_s4 + $0x180] sm:$0xff]  ;;  %v273_v31 = vld [vmem:[%s1137_s4 + $0x190] sm:$0xff] }
  0x60   : > { %524 = vmatpush1.xpose.msra.mxu1 %v303_v11  ;;  %454 = vmatprep.subr.mxu0 %v296_v12  ;;  %v266_v32 = vld [vmem:[%s1137_s4 + $0x158] sm:$0xff]  ;;  %v268_v33 = vld [vmem:[%s1137_s4 + $0x168] sm:$0xff]  ;;  %v265_v34 = vld [vmem:[%s1137_s4 + $0x150] sm:$0xff] }
  0x61   : > { %525 = vmatprep.subr.mxu1 %v298_v13  ;;  %v267_v35 = vld [vmem:[%s1137_s4 + $0x160] sm:$0xff]  ;;  %v260_v37 = vld [vmem:[%s1137_s4 + $0x128] sm:$0xff]  ;;  %v262_v38 = vld [vmem:[%s1137_s4 + $0x138] sm:$0xff] }
  0x62   : > { %v259_v39 = vld [vmem:[%s1137_s4 + $0x120] sm:$0xff]  ;;  %v261_v40 = vld [vmem:[%s1137_s4 + $0x130] sm:$0xff]  ;;  %v254_v42 = vld [vmem:[%s1137_s4 + $0xf8] sm:$0xff] }
  0x63   : > { %455 = vmatpush1.xpose.msra.mxu0 %v295_v14  ;;  %v256_v43 = vld [vmem:[%s1137_s4 + $0x108] sm:$0xff]  ;;  %v253_v44 = vld [vmem:[%s1137_s4 + $0xf0] sm:$0xff]  ;;  %v255_v45 = vld [vmem:[%s1137_s4 + $0x100] sm:$0xff] }
  0x64   : > { %526 = vmatpush1.xpose.msra.mxu1 %v297_v15  ;;  %456 = vmatprep.subr.mxu0 %v290_v16  ;;  %v248_v48 = vld [vmem:[%s1137_s4 + $0xc8] sm:$0xff]  ;;  %v250_v49 = vld [vmem:[%s1137_s4 + $0xd8] sm:$0xff]  ;;  %v1198_v50 = vld [vmem:[#allocation6] sm:$0x3f] }
  0x65   : > { %527 = vmatprep.subr.mxu1 %v292_v17  ;;  %v247_v51 = vld [vmem:[%s1137_s4 + $0xc0] sm:$0xff]  ;;  %v249_v52 = vld [vmem:[%s1137_s4 + $0xd0] sm:$0xff]  ;;  %v425_v53 = vrot.slane %v1198_v50, %v424_v46  ;;  %v433_v54 = vrot.slane %v1198_v50, %v432_v47  ;;  %v242_v55 = vld [vmem:[%s1137_s4 + $0x98] sm:$0xff] }
  0x66   : > { %v244_v56 = vld [vmem:[%s1137_s4 + $0xa8] sm:$0xff]  ;;  %v241_v57 = vld [vmem:[%s1137_s4 + $0x90] sm:$0xff]  ;;  %v243_v58 = vld [vmem:[%s1137_s4 + $0xa0] sm:$0xff] }
  0x67   : > { %457 = vmatpush1.xpose.msra.mxu0 %v289_v18  ;;  %512 = vmatprep.mubr.f32.mxu0 %v425_v53  ;;  %v236_v59 = vld [vmem:[%s1137_s4 + $0x68] sm:$0xff]  ;;  %v238_v60 = vld [vmem:[%s1137_s4 + $0x78] sm:$0xff]  ;;  %v235_v61 = vld [vmem:[%s1137_s4 + $0x60] sm:$0xff] }
  0x68   : > { %528 = vmatpush1.xpose.msra.mxu1 %v291_v19  ;;  %458 = vmatprep.subr.mxu0 %v284_v20  ;;  %v237_v62 = vld [vmem:[%s1137_s4 + $0x70] sm:$0xff]  ;;  %v230_v63 = vld [vmem:[%s1137_s4 + $0x38] sm:$0xff]  ;;  %v232_v0 = vld [vmem:[%s1137_s4 + $0x48] sm:$0xff] }
  0x69   : > { %529 = vmatprep.subr.mxu1 %v286_v21  ;;  %583 = vmatprep.mubr.f32.mxu1 %v433_v54  ;;  %v229_v1 = vld [vmem:[%s1137_s4 + $0x30] sm:$0xff]  ;;  %v231_v2 = vld [vmem:[%s1137_s4 + $0x40] sm:$0xff]  ;;  %v224_v3 = vld [vmem:[%s1137_s4 + $0x8] sm:$0xff] }
  0x6a   : > { %v226_v4 = vld [vmem:[%s1137_s4 + $0x18] sm:$0xff]  ;;  %v223_v5 = vld [vmem:[%s1137_s4] sm:$0xff]  ;;  %v225_v6 = vld [vmem:[%s1137_s4 + $0x10] sm:$0xff] }
  0x6b   : > { %459 = vmatpush1.xpose.msra.mxu0 %v283_v22  ;;  %v410_v7 = vld [vmem:[%s1137_s4 + $0x5d8] sm:$0xff]  ;;  %v412_v8 = vld [vmem:[%s1137_s4 + $0x5e8] sm:$0xff]  ;;  %v409_v9 = vld [vmem:[%s1137_s4 + $0x5d0] sm:$0xff] }
  0x6c   : > { %530 = vmatpush1.xpose.msra.mxu1 %v285_v23  ;;  %460 = vmatprep.subr.mxu0 %v278_v24  ;;  %v411_v10 = vld [vmem:[%s1137_s4 + $0x5e0] sm:$0xff]  ;;  %v404_v11 = vld [vmem:[%s1137_s4 + $0x5a8] sm:$0xff]  ;;  %v406_v12 = vld [vmem:[%s1137_s4 + $0x5b8] sm:$0xff] }
  0x6d   : > { %531 = vmatprep.subr.mxu1 %v280_v25  ;;  %v403_v13 = vld [vmem:[%s1137_s4 + $0x5a0] sm:$0xff]  ;;  %v405_v14 = vld [vmem:[%s1137_s4 + $0x5b0] sm:$0xff]  ;;  %v398_v15 = vld [vmem:[%s1137_s4 + $0x578] sm:$0xff] }
  0x6e   : > { %v400_v16 = vld [vmem:[%s1137_s4 + $0x588] sm:$0xff]  ;;  %v397_v17 = vld [vmem:[%s1137_s4 + $0x570] sm:$0xff]  ;;  %v399_v18 = vld [vmem:[%s1137_s4 + $0x580] sm:$0xff] }
  0x6f   : > { %461 = vmatpush1.xpose.msra.mxu0 %v277_v26  ;;  %v392_v19 = vld [vmem:[%s1137_s4 + $0x548] sm:$0xff]  ;;  %v394_v20 = vld [vmem:[%s1137_s4 + $0x558] sm:$0xff]  ;;  %v391_v21 = vld [vmem:[%s1137_s4 + $0x540] sm:$0xff] }
  0x70   : > { %532 = vmatpush1.xpose.msra.mxu1 %v279_v27  ;;  %462 = vmatprep.subr.mxu0 %v272_v28  ;;  %v393_v22 = vld [vmem:[%s1137_s4 + $0x550] sm:$0xff]  ;;  %v386_v23 = vld [vmem:[%s1137_s4 + $0x518] sm:$0xff]  ;;  %v388_v24 = vld [vmem:[%s1137_s4 + $0x528] sm:$0xff] }
  0x71   : > { %533 = vmatprep.subr.mxu1 %v274_v29  ;;  %v385_v25 = vld [vmem:[%s1137_s4 + $0x510] sm:$0xff]  ;;  %v387_v26 = vld [vmem:[%s1137_s4 + $0x520] sm:$0xff]  ;;  %v380_v27 = vld [vmem:[%s1137_s4 + $0x4e8] sm:$0xff] }
  0x72   : > { %v382_v28 = vld [vmem:[%s1137_s4 + $0x4f8] sm:$0xff]  ;;  %v379_v29 = vld [vmem:[%s1137_s4 + $0x4e0] sm:$0xff]  ;;  %v344_v54 = vld [vmem:[%s1137_s4 + $0x3c8] sm:$0xff] }
  0x73   : > { %463 = vmatpush1.xpose.msra.mxu0 %v271_v30  ;;  %v381_v30 = vld [vmem:[%s1137_s4 + $0x4f0] sm:$0xff]  ;;  %v358_v46 = vld [vmem:[%s1137_s4 + $0x438] sm:$0xff]  ;;  %v355_v47 = vld [vmem:[%s1137_s4 + $0x420] sm:$0xff] }
  0x74   : > { %534 = vmatpush1.xpose.msra.mxu1 %v273_v31  ;;  %464 = vmatprep.subr.mxu0 %v266_v32  ;;  %v374_v31 = vld [vmem:[%s1137_s4 + $0x4b8] sm:$0xff]  ;;  %v376_v32 = vld [vmem:[%s1137_s4 + $0x4c8] sm:$0xff]  ;;  %v351_v53 = vld [vmem:[%s1137_s4 + $0x400] sm:$0xff] }
  0x75   : > { %535 = vmatprep.subr.mxu1 %v268_v33  ;;  %v373_v33 = vld [vmem:[%s1137_s4 + $0x4b0] sm:$0xff] }
  0x77   : > { %465 = vmatpush1.xpose.msra.mxu0 %v265_v34  ;;  %v375_v34 = vld [vmem:[%s1137_s4 + $0x4c0] sm:$0xff] }
  0x78   : > { %536 = vmatpush1.xpose.msra.mxu1 %v267_v35  ;;  %466 = vmatprep.subr.mxu0 %v260_v37  ;;  %v368_v35 = vld [vmem:[%s1137_s4 + $0x488] sm:$0xff]  ;;  %v370_v37 = vld [vmem:[%s1137_s4 + $0x498] sm:$0xff] }
  0x79   : > { %537 = vmatprep.subr.mxu1 %v262_v38  ;;  %v367_v38 = vld [vmem:[%s1137_s4 + $0x480] sm:$0xff] }
  0x7b   : > { %467 = vmatpush1.xpose.msra.mxu0 %v259_v39  ;;  %v369_v39 = vld [vmem:[%s1137_s4 + $0x490] sm:$0xff] }
  0x7c   : > { %538 = vmatpush1.xpose.msra.mxu1 %v261_v40  ;;  %468 = vmatprep.subr.mxu0 %v254_v42  ;;  %v362_v40 = vld [vmem:[%s1137_s4 + $0x458] sm:$0xff]  ;;  %v364_v42 = vld [vmem:[%s1137_s4 + $0x468] sm:$0xff] }
  0x7d   : > { %539 = vmatprep.subr.mxu1 %v256_v43  ;;  %v361_v43 = vld [vmem:[%s1137_s4 + $0x450] sm:$0xff] }
  0x7f   : > { %469 = vmatpush1.xpose.msra.mxu0 %v253_v44  ;;  %v363_v44 = vld [vmem:[%s1137_s4 + $0x460] sm:$0xff] }
  0x80   : > { %540 = vmatpush1.xpose.msra.mxu1 %v255_v45  ;;  %470 = vmatprep.subr.mxu0 %v248_v48  ;;  %v356_v45 = vld [vmem:[%s1137_s4 + $0x428] sm:$0xff]  ;;  %v357_v48 = vld [vmem:[%s1137_s4 + $0x430] sm:$0xff] }
  0x81   : > { %541 = vmatprep.subr.mxu1 %v250_v49  ;;  %v350_v49 = vld [vmem:[%s1137_s4 + $0x3f8] sm:$0xff] }
  0x83   : > { %471 = vmatpush1.xpose.msra.mxu0 %v247_v51  ;;  %v352_v51 = vld [vmem:[%s1137_s4 + $0x408] sm:$0xff] }
  0x84   : > { %542 = vmatpush1.xpose.msra.mxu1 %v249_v52  ;;  %472 = vmatprep.subr.mxu0 %v242_v55  ;;  %v349_v52 = vld [vmem:[%s1137_s4 + $0x3f0] sm:$0xff]  ;;  %v346_v55 = vld [vmem:[%s1137_s4 + $0x3d8] sm:$0xff] }
  0x85   : > { %543 = vmatprep.subr.mxu1 %v244_v56  ;;  %v343_v56 = vld [vmem:[%s1137_s4 + $0x3c0] sm:$0xff] }
  0x87   : > { %473 = vmatpush1.xpose.msra.mxu0 %v241_v57  ;;  %v345_v57 = vld [vmem:[%s1137_s4 + $0x3d0] sm:$0xff] }
  0x88   : > { %544 = vmatpush1.xpose.msra.mxu1 %v243_v58  ;;  %474 = vmatprep.subr.mxu0 %v236_v59  ;;  %v338_v58 = vld [vmem:[%s1137_s4 + $0x398] sm:$0xff]  ;;  %v340_v59 = vld [vmem:[%s1137_s4 + $0x3a8] sm:$0xff] }
  0x89   : > { %545 = vmatprep.subr.mxu1 %v238_v60  ;;  %v337_v60 = vld [vmem:[%s1137_s4 + $0x390] sm:$0xff] }
  0x8b   : > { %475 = vmatpush1.xpose.msra.mxu0 %v235_v61  ;;  %v339_v61 = vld [vmem:[%s1137_s4 + $0x3a0] sm:$0xff] }
  0x8c   : > { %546 = vmatpush1.xpose.msra.mxu1 %v237_v62  ;;  %476 = vmatprep.subr.mxu0 %v230_v63  ;;  %v332_v62 = vld [vmem:[%s1137_s4 + $0x368] sm:$0xff]  ;;  %v334_v63 = vld [vmem:[%s1137_s4 + $0x378] sm:$0xff] }
  0x8d   : > { %547 = vmatprep.subr.mxu1 %v232_v0  ;;  %v331_v0 = vld [vmem:[%s1137_s4 + $0x360] sm:$0xff] }
  0x8f   : > { %477 = vmatpush1.xpose.msra.mxu0 %v229_v1  ;;  %v333_v1 = vld [vmem:[%s1137_s4 + $0x370] sm:$0xff] }
  0x90   : > { %548 = vmatpush1.xpose.msra.mxu1 %v231_v2  ;;  %478 = vmatprep.subr.mxu0 %v224_v3  ;;  %v326_v2 = vld [vmem:[%s1137_s4 + $0x338] sm:$0xff]  ;;  %v328_v3 = vld [vmem:[%s1137_s4 + $0x348] sm:$0xff] }
  0x91   : > { %549 = vmatprep.subr.mxu1 %v226_v4  ;;  %v325_v4 = vld [vmem:[%s1137_s4 + $0x330] sm:$0xff] }
  0x93   : > { %479 = vmatpush1.xpose.msra.mxu0 %v223_v5  ;;  %v327_v5 = vld [vmem:[%s1137_s4 + $0x340] sm:$0xff] }
  0x94   : > { %550 = vmatpush1.xpose.msra.mxu1 %v225_v6  ;;  %480 = vmatprep.subr.mxu0 %v410_v7  ;;  %v320_v6 = vld [vmem:[%s1137_s4 + $0x308] sm:$0xff]  ;;  %v322_v7 = vld [vmem:[%s1137_s4 + $0x318] sm:$0xff] }
  0x95   : > { %551 = vmatprep.subr.mxu1 %v412_v8  ;;  %v420_v8 = vsub.s32 0, %v1188_v41 }
  0x97   : > { %481 = vmatpush2.xpose.msra.mxu0 %v409_v9  ;;  %v428_v9 = vsub.s32 2, %v1188_v41 }
  0x98   : > { %552 = vmatpush2.xpose.msra.mxu1 %v411_v10  ;;  %482 = vmatprep.subr.mxu0 %v404_v11  ;;  %v319_v10 = vld [vmem:[%s1137_s4 + $0x300] sm:$0xff]  ;;  %v321_v11 = vld [vmem:[%s1137_s4 + $0x310] sm:$0xff] }
  0x99   : > { %553 = vmatprep.subr.mxu1 %v406_v12  ;;  %v318_v12 = vld [vmem:[%s1137_s4 + $0x2f8] sm:$0xff] }
  0x9b   : > { %483 = vmatpush2.xpose.msra.mxu0 %v403_v13  ;;  %v440_v13 = vsub.s32 5, %v1188_v41 }
  0x9c   : > { %554 = vmatpush2.xpose.msra.mxu1 %v405_v14  ;;  %484 = vmatprep.subr.mxu0 %v398_v15  ;;  %v421_v14 = vrot.slane %v1198_v50, %v420_v8  ;;  %v429_v15 = vrot.slane %v1198_v50, %v428_v9  ;;  %v353_v8 = vld [vmem:[%s1137_s4 + $0x410] sm:$0xff]  ;;  %v348_v9 = vld [vmem:[%s1137_s4 + $0x3e8] sm:$0xff] }
  0x9d   : > { %555 = vmatprep.subr.mxu1 %v400_v16  ;;  %v441_v16 = vrot.slane %v1198_v50, %v440_v13  ;;  %v336_v13 = vld [vmem:[%s1137_s4 + $0x388] sm:$0xff] }
  0x9f   : > { %485 = vmatpush2.xpose.msra.mxu0 %v397_v17  ;;  %v317_v17 = vld [vmem:[%s1137_s4 + $0x2f0] sm:$0xff] }
  0xa0   : > { %556 = vmatpush2.xpose.msra.mxu1 %v399_v18  ;;  %486 = vmatprep.subr.mxu0 %v392_v19  ;;  %v312_v18 = vld [vmem:[%s1137_s4 + $0x2c8] sm:$0xff]  ;;  %v311_v19 = vld [vmem:[%s1137_s4 + $0x2c0] sm:$0xff] }
  0xa1   : > { %557 = vmatprep.subr.mxu1 %v394_v20  ;;  %v306_v20 = vld [vmem:[%s1137_s4 + $0x298] sm:$0xff] }
  0xa3   : > { %487 = vmatpush2.xpose.msra.mxu0 %v391_v21  ;;  %v305_v21 = vld [vmem:[%s1137_s4 + $0x290] sm:$0xff] }
  0xa4   : > { %558 = vmatpush2.xpose.msra.mxu1 %v393_v22  ;;  %488 = vmatprep.subr.mxu0 %v386_v23  ;;  %v300_v22 = vld [vmem:[%s1137_s4 + $0x268] sm:$0xff]  ;;  %v299_v23 = vld [vmem:[%s1137_s4 + $0x260] sm:$0xff] }
  0xa5   : > { %559 = vmatprep.subr.mxu1 %v388_v24  ;;  %v294_v24 = vld [vmem:[%s1137_s4 + $0x238] sm:$0xff] }
  0xa7   : > { %489 = vmatpush2.xpose.msra.mxu0 %v385_v25  ;;  %v293_v25 = vld [vmem:[%s1137_s4 + $0x230] sm:$0xff] }
  0xa8   : > { %560 = vmatpush2.xpose.msra.mxu1 %v387_v26  ;;  %490 = vmatprep.subr.mxu0 %v380_v27  ;;  %v288_v26 = vld [vmem:[%s1137_s4 + $0x208] sm:$0xff]  ;;  %v287_v27 = vld [vmem:[%s1137_s4 + $0x200] sm:$0xff] }
  0xa9   : > { %561 = vmatprep.subr.mxu1 %v382_v28  ;;  %v282_v28 = vld [vmem:[%s1137_s4 + $0x1d8] sm:$0xff] }
  0xab   : > { %491 = vmatpush2.xpose.msra.mxu0 %v379_v29  ;;  %v281_v29 = vld [vmem:[%s1137_s4 + $0x1d0] sm:$0xff] }
  0xac   : > { %562 = vmatpush2.xpose.msra.mxu1 %v381_v30  ;;  %492 = vmatprep.subr.mxu0 %v374_v31  ;;  %v276_v30 = vld [vmem:[%s1137_s4 + $0x1a8] sm:$0xff]  ;;  %v275_v31 = vld [vmem:[%s1137_s4 + $0x1a0] sm:$0xff] }
  0xad   : > { %563 = vmatprep.subr.mxu1 %v376_v32  ;;  %v270_v32 = vld [vmem:[%s1137_s4 + $0x178] sm:$0xff] }
  0xaf   : > { %493 = vmatpush2.xpose.msra.mxu0 %v373_v33  ;;  %v269_v33 = vld [vmem:[%s1137_s4 + $0x170] sm:$0xff] }
  0xb0   : > { %564 = vmatpush2.xpose.msra.mxu1 %v375_v34  ;;  %494 = vmatprep.subr.mxu0 %v368_v35  ;;  %v264_v34 = vld [vmem:[%s1137_s4 + $0x148] sm:$0xff]  ;;  %v263_v35 = vld [vmem:[%s1137_s4 + $0x140] sm:$0xff] }
  0xb1   : > { %565 = vmatprep.subr.mxu1 %v370_v37  ;;  %v258_v37 = vld [vmem:[%s1137_s4 + $0x118] sm:$0xff] }
  0xb3   : > { %495 = vmatpush2.xpose.msra.mxu0 %v367_v38  ;;  %v257_v38 = vld [vmem:[%s1137_s4 + $0x110] sm:$0xff] }
  0xb4   : > { %566 = vmatpush2.xpose.msra.mxu1 %v369_v39  ;;  %496 = vmatprep.subr.mxu0 %v362_v40  ;;  %v252_v39 = vld [vmem:[%s1137_s4 + $0xe8] sm:$0xff]  ;;  %v251_v40 = vld [vmem:[%s1137_s4 + $0xe0] sm:$0xff] }
  0xb5   : > { %567 = vmatprep.subr.mxu1 %v364_v42  ;;  %v246_v42 = vld [vmem:[%s1137_s4 + $0xb8] sm:$0xff] }
  0xb7   : > { %497 = vmatpush2.xpose.msra.mxu0 %v361_v43  ;;  %v245_v43 = vld [vmem:[%s1137_s4 + $0xb0] sm:$0xff] }
  0xb8   : > { %568 = vmatpush2.xpose.msra.mxu1 %v363_v44  ;;  %498 = vmatprep.subr.mxu0 %v356_v45  ;;  %v240_v44 = vld [vmem:[%s1137_s4 + $0x88] sm:$0xff]  ;;  %v239_v45 = vld [vmem:[%s1137_s4 + $0x80] sm:$0xff] }
  0xb9   : > { %569 = vmatprep.subr.mxu1 %v358_v46  ;;  %v234_v46 = vld [vmem:[%s1137_s4 + $0x58] sm:$0xff] }
  0xbb   : > { %499 = vmatpush2.xpose.msra.mxu0 %v355_v47  ;;  %v233_v47 = vld [vmem:[%s1137_s4 + $0x50] sm:$0xff] }
  0xbc   : > { %570 = vmatpush2.xpose.msra.mxu1 %v357_v48  ;;  %500 = vmatprep.subr.mxu0 %v350_v49  ;;  %v228_v48 = vld [vmem:[%s1137_s4 + $0x28] sm:$0xff]  ;;  %v227_v49 = vld [vmem:[%s1137_s4 + $0x20] sm:$0xff] }
  0xbd   : > { %571 = vmatprep.subr.mxu1 %v352_v51  ;;  %v414_v51 = vld [vmem:[%s1137_s4 + $0x5f8] sm:$0xff] }
  0xbf   : > { %501 = vmatpush2.xpose.msra.mxu0 %v349_v52  ;;  %v413_v52 = vld [vmem:[%s1137_s4 + $0x5f0] sm:$0xff] }
  0xc0   : > { %572 = vmatpush2.xpose.msra.mxu1 %v351_v53  ;;  %502 = vmatprep.subr.mxu0 %v344_v54  ;;  %v408_v53 = vld [vmem:[%s1137_s4 + $0x5c8] sm:$0xff]  ;;  %v407_v54 = vld [vmem:[%s1137_s4 + $0x5c0] sm:$0xff] }
  0xc1   : > { %573 = vmatprep.subr.mxu1 %v346_v55  ;;  %v402_v55 = vld [vmem:[%s1137_s4 + $0x598] sm:$0xff] }
  0xc3   : > { %503 = vmatpush2.xpose.msra.mxu0 %v343_v56  ;;  %v401_v56 = vld [vmem:[%s1137_s4 + $0x590] sm:$0xff] }
  0xc4   : > { %574 = vmatpush2.xpose.msra.mxu1 %v345_v57  ;;  %504 = vmatprep.subr.mxu0 %v338_v58  ;;  %v396_v57 = vld [vmem:[%s1137_s4 + $0x568] sm:$0xff]  ;;  %v395_v58 = vld [vmem:[%s1137_s4 + $0x560] sm:$0xff] }
  0xc5   : > { %575 = vmatprep.subr.mxu1 %v340_v59  ;;  %v390_v59 = vld [vmem:[%s1137_s4 + $0x538] sm:$0xff] }
  0xc7   : > { %505 = vmatpush2.xpose.msra.mxu0 %v337_v60  ;;  %v389_v60 = vld [vmem:[%s1137_s4 + $0x530] sm:$0xff] }
  0xc8   : > { %576 = vmatpush2.xpose.msra.mxu1 %v339_v61  ;;  %506 = vmatprep.subr.mxu0 %v332_v62  ;;  %v384_v61 = vld [vmem:[%s1137_s4 + $0x508] sm:$0xff]  ;;  %v383_v62 = vld [vmem:[%s1137_s4 + $0x500] sm:$0xff] }
  0xc9   : > { %577 = vmatprep.subr.mxu1 %v334_v63  ;;  %v378_v63 = vld [vmem:[%s1137_s4 + $0x4d8] sm:$0xff] }
  0xcb   : > { %507 = vmatpush2.xpose.msra.mxu0 %v331_v0  ;;  %v377_v0 = vld [vmem:[%s1137_s4 + $0x4d0] sm:$0xff] }
  0xcc   : > { %578 = vmatpush2.xpose.msra.mxu1 %v333_v1  ;;  %508 = vmatprep.subr.mxu0 %v326_v2  ;;  %v372_v1 = vld [vmem:[%s1137_s4 + $0x4a8] sm:$0xff]  ;;  %v371_v2 = vld [vmem:[%s1137_s4 + $0x4a0] sm:$0xff] }
  0xcd   : > { %579 = vmatprep.subr.mxu1 %v328_v3  ;;  %v366_v3 = vld [vmem:[%s1137_s4 + $0x478] sm:$0xff] }
  0xcf   : > { %509 = vmatpush2.xpose.msra.mxu0 %v325_v4  ;;  %v365_v4 = vld [vmem:[%s1137_s4 + $0x470] sm:$0xff] }
  0xd0   : > { %580 = vmatpush2.xpose.msra.mxu1 %v327_v5  ;;  %510 = vmatprep.subr.mxu0 %v320_v6  ;;  %v360_v5 = vld [vmem:[%s1137_s4 + $0x448] sm:$0xff]  ;;  %v359_v6 = vld [vmem:[%s1137_s4 + $0x440] sm:$0xff] }
  0xd1   : > { %581 = vmatprep.subr.mxu1 %v322_v7  ;;  %v354_v7 = vld [vmem:[%s1137_s4 + $0x418] sm:$0xff] }
  0xd3   : > { %511 = vmatpush2.xpose.msra.mxu0 %v319_v10  ;;  %v347_v10 = vld [vmem:[%s1137_s4 + $0x3e0] sm:$0xff] }
  0xd4   : > { %582 = vmatpush2.xpose.msra.mxu1 %v321_v11  ;;  %590 = vmatprep.subr.mxu0 %v318_v12  ;;  %v342_v11 = vld [vmem:[%s1137_s4 + $0x3b8] sm:$0xff]  ;;  %v341_v12 = vld [vmem:[%s1137_s4 + $0x3b0] sm:$0xff] }
  0xd6   : > { %513 = vmatmul.mubr.f32.vlgmr.msra.gmra.mxu0 %v421_v14  ;;  %v335_v14 = vld [vmem:[%s1137_s4 + $0x380] sm:$0xff] }
  0xd7   : > { %584 = vmatmul.mubr.f32.vlgmr.msra.gmra.mxu1 %v429_v15  ;;  %591 = vmatpush1.xpose.msra.mxu0 %v317_v17  ;;  %v330_v15 = vld [vmem:[%s1137_s4 + $0x358] sm:$0xff]  ;;  %v324_v17 = vld [vmem:[%s1137_s4 + $0x328] sm:$0xff] }
  0xd8   : > { %654 = vmatprep.mubr.f32.mxu0 %v441_v16  ;;  %592 = vmatprep.subr.mxu0 %v312_v18  ;;  %v329_v16 = vld [vmem:[%s1137_s4 + $0x350] sm:$0xff]  ;;  %v436_v18 = vsub.s32 4, %v1188_v41 }
  0xdb   : > { %593 = vmatpush1.xpose.msra.mxu0 %v311_v19  ;;  %v323_v19 = vld [vmem:[%s1137_s4 + $0x320] sm:$0xff] }
  0xdc   : > { %594 = vmatprep.subr.mxu0 %v306_v20  ;;  %v437_v20 = vrot.slane %v1198_v50, %v436_v18 }
  0xdf   : > { %595 = vmatpush1.xpose.msra.mxu0 %v305_v21 }
  0xe0   : > { %596 = vmatprep.subr.mxu0 %v300_v22  ;;  %v416_v22 = vstv %s415_s24 }
  0xe3   : > { %597 = vmatpush1.xpose.msra.mxu0 %v299_v23 }
  0xe4   : > { %598 = vmatprep.subr.mxu0 %v294_v24 }
  0xe7   : > { %599 = vmatpush1.xpose.msra.mxu0 %v293_v25  ;;  %v988_v25 = vmov 1966171168  }
  0xe8   : > { %600 = vmatprep.subr.mxu0 %v288_v26  ;;  %v665_v26 = vunpack.c.l.s4 %v988_v25 }
  0xeb   : > { %601 = vmatpush1.xpose.msra.mxu0 %v287_v27 }
  0xec   : > { %602 = vmatprep.subr.mxu0 %v282_v28 }
  0xef   : > { %603 = vmatpush1.xpose.msra.mxu0 %v281_v29 }
  0xf0   : > { %604 = vmatprep.subr.mxu0 %v276_v30  ;;  %v666_v30 = vunpack.c.0.s8 %v665_v26 }
  0xf3   : > { %605 = vmatpush1.xpose.msra.mxu0 %v275_v31 }
  0xf4   : > { %606 = vmatprep.subr.mxu0 %v270_v32 }
  0xf7   : > { %607 = vmatpush1.xpose.msra.mxu0 %v269_v33 }
  0xf8   : > { %608 = vmatprep.subr.mxu0 %v264_v34 }
  0xfb   : > { %609 = vmatpush1.xpose.msra.mxu0 %v263_v35 }
  0xfc   : > { %610 = vmatprep.subr.mxu0 %v258_v37  ;;  %v669_v37 = vsub.s32 %v666_v30, %v1188_v41 }
  0xff   : > { %611 = vmatpush1.xpose.msra.mxu0 %v257_v38 }
 0x100   : > { %612 = vmatprep.subr.mxu0 %v252_v39 }
 0x103   : > { %613 = vmatpush1.xpose.msra.mxu0 %v251_v40 }
 0x104   : > { %614 = vmatprep.subr.mxu0 %v246_v42 }
 0x107   : > { %615 = vmatpush1.xpose.msra.mxu0 %v245_v43 }
 0x108   : > { %616 = vmatprep.subr.mxu0 %v240_v44 }
 0x10b   : > { %617 = vmatpush1.xpose.msra.mxu0 %v239_v45 }
 0x10c   : > { %618 = vmatprep.subr.mxu0 %v234_v46 }
 0x10f   : > { %619 = vmatpush1.xpose.msra.mxu0 %v233_v47 }
 0x110   : > { %620 = vmatprep.subr.mxu0 %v228_v48 }
 0x113   : > { %621 = vmatpush1.xpose.msra.mxu0 %v227_v49 }
 0x114   : > { %622 = vmatprep.subr.mxu0 %v414_v51 }
 0x117   : > { %623 = vmatpush2.xpose.msra.mxu0 %v413_v52 }
 0x118   : > { %624 = vmatprep.subr.mxu0 %v408_v53 }
 0x11b   : > { %625 = vmatpush2.xpose.msra.mxu0 %v407_v54 }
 0x11c   : > { %626 = vmatprep.subr.mxu0 %v402_v55 }
 0x11f   : > { %627 = vmatpush2.xpose.msra.mxu0 %v401_v56 }
 0x120   : > { %628 = vmatprep.subr.mxu0 %v396_v57 }
 0x123   : > { %629 = vmatpush2.xpose.msra.mxu0 %v395_v58 }
 0x124   : > { %630 = vmatprep.subr.mxu0 %v390_v59 }
 0x127   : > { %631 = vmatpush2.xpose.msra.mxu0 %v389_v60 }
 0x128   : > { %632 = vmatprep.subr.mxu0 %v384_v61 }
 0x12b   : > { %633 = vmatpush2.xpose.msra.mxu0 %v383_v62 }
 0x12c   : > { %634 = vmatprep.subr.mxu0 %v378_v63 }
 0x12f   : > { %635 = vmatpush2.xpose.msra.mxu0 %v377_v0 }
 0x130   : > { %636 = vmatprep.subr.mxu0 %v372_v1 }
 0x133   : > { %637 = vmatpush2.xpose.msra.mxu0 %v371_v2 }
 0x134   : > { %638 = vmatprep.subr.mxu0 %v366_v3 }
 0x137   : > { %639 = vmatpush2.xpose.msra.mxu0 %v365_v4 }
 0x138   : > { %640 = vmatprep.subr.mxu0 %v360_v5 }
 0x13b   : > { %641 = vmatpush2.xpose.msra.mxu0 %v359_v6 }
 0x13c   : > { %642 = vmatprep.subr.mxu0 %v354_v7 }
 0x13f   : > { %643 = vmatpush2.xpose.msra.mxu0 %v353_v8 }
 0x140   : > { %644 = vmatprep.subr.mxu0 %v348_v9 }
 0x143   : > { %645 = vmatpush2.xpose.msra.mxu0 %v347_v10 }
 0x144   : > { %646 = vmatprep.subr.mxu0 %v342_v11 }
 0x147   : > { %647 = vmatpush2.xpose.msra.mxu0 %v341_v12 }
 0x148   : > { %648 = vmatprep.subr.mxu0 %v336_v13 }
 0x14b   : > { %649 = vmatpush2.xpose.msra.mxu0 %v335_v14 }
 0x14c   : > { %650 = vmatprep.subr.mxu0 %v330_v15 }
 0x14f   : > { %651 = vmatpush2.xpose.msra.mxu0 %v329_v16 }
 0x150   : > { %652 = vmatprep.subr.mxu0 %v324_v17 }
 0x153   : > { %653 = vmatpush2.xpose.msra.mxu0 %v323_v19 }
 0x156   : > { %655 = vmatmul.mubr.f32.vlgmr.msra.gmra.mxu0 %v437_v20 }
 0x196   : > { %v514_v21 = vpop.f32.mrf.mxu0 }
 0x197   : > { %v585_v24 = vpop.f32.mrf.mxu1  ;;  %v515_v27 = vadd.f32 %v514_v21, %v416_v22 }
 0x198   : > { %v516_v23 = vpop.f32.mrf.mxu0 }
 0x199   : > { %v517_v28 = vadd.f32 %v516_v23, %v416_v22  ;;  %v587_v29 = vpop.f32.mrf.mxu1  ;;  %v586_v32 = vadd.f32 %v585_v24, %v515_v27 }
 0x19b   : > { %v588_v33 = vadd.f32 %v587_v29, %v517_v28 }
 0x216   : > { %v656_v31 = vpop.f32.mrf.mxu0 }
 0x217   : > { %v657_v50 = vadd.f32 %v656_v31, %v586_v32 }
 0x218   : > { %v658_v34 = vpop.f32.mrf.mxu0 }
 0x219   : > { %v659_v35 = vadd.f32 %v658_v34, %v588_v33 }
 0x21b   : > { %v663_v38 = vcombine.low %v657_v50, %v659_v35 }
 0x21d   : > { %v670_v39 = vrot.slane %v663_v38, %v669_v37  ;;  %691 = sbr.rel (!%p1420_p4) target bundleno = 572 (0x23c), region = 44 }
 0x21f   : > { %v677_v40 = vrot.slane %v670_v39, %v669_v37 }
 0x221   : > { %683 = vst.msk [vmem:[%s210_s10] sm:$0x3] %vm681_vm0, %v677_v40 }
 0x222   : > { %s1430_s28 = smov (!%p694_p13, %s693_s28), 2 }
 0x223   : > { %s1363_s5 = sshll.u32 %s1430_s28, 4 }
 0x224   : > { %s698_s6 = ssub.s32 32, %s1363_s5 }
 0x225   : > { %699 = vsyncadd %s685_s12, %s698_s6  ;;  %p801_p5 = scmp.ne.s32.totalorder %s1363_s5, 0  ;;  %s805_s7 = sshll.u32 %s1034_s2, 5 }
 0x226   : > { %s702_s9 = scalar_lea.hbm %s1411_s3, %s805_s7  ;;  %s704_s11 = sshll.u32 %s210_s10, 4  ;;  %s705_s11 = int_to_ptr.vmem [resolvable:$true] %s704_s11 }
 0x227   : > { %s914_s13 = scalar_lea.vmem %s705_s11, %s1363_s5  ;;  %s989_s18 = smov [#allocation8]  }
 0x228   : > { %p915_p1 = scmp.ne.s32.totalorder %s705_s11, %s914_s13  ;;  %s918_s21 = sshll.u32 %s989_s18, 4  ;;  %s919_s21 = int_to_ptr.vmem [resolvable:$false] %s918_s21 }
 0x229   : > { %s920_s29 = scalar_lea.vmem %s919_s21, 64  ;;  %p921_p3 = scmp.lt.s32.totalorder %s705_s11, %s919_s21 }
 0x22a   : > { %p916_p0 = pnand %p915_p1, %p801_p5  ;;  %p922_p8 = scmp.lt.s32.totalorder %s920_s29, %s914_s13 }
 0x22c   : > { %p917_p7 = pneg %p916_p0  ;;  %p923_p9 = por %p922_p8, %p921_p3 }
 0x22e   : > { %p924_p6 = pnand %p923_p9, %p917_p7 }
 0x230   : > { %927 = shalt.err (!%p924_p6)
}
 0x231   : > { %s928_s2 = scalar_lea.hbm %s702_s9, %s1363_s5  ;;  %s932_s24 = scalar_lea.hbm %s1411_s3, 48 }
 0x232   : > { %p929_p11 = scmp.ne.s32.totalorder %s702_s9, %s928_s2  ;;  %p933_p10 = scmp.lt.s32.totalorder %s702_s9, %s1411_s3 }
 0x233   : > { %p934_p4 = scmp.lt.s32.totalorder %s932_s24, %s928_s2 }
 0x234   : > { %p930_p12 = pnand %p929_p11, %p801_p5 }
 0x235   : > { %p935_p13 = por %p934_p4, %p933_p10 }
 0x236   : > { %p931_p2 = pneg %p930_p12 }
 0x238   : > { %p936_p1 = pnand %p935_p13, %p931_p2 }
 0x23a   : > { %939 = shalt.err (!%p936_p1)
}
 0x23b   : > { %707 = dma.vmem_to_hbm [thread:$0]  (%p801_p5), %s705_s11, %s1363_s5, %s702_s9, %s685_s12  }
 0x23c PF: > { %s716_s20 = sand.u32 1, %s970_s14   ;;  %p1421_p0 = scmp.ne.s32.totalorder %s1417_s26, 0 }
 0x23d   : > { %p1422_p7 = scmp.ge.s32.totalorder %s982_s17, 2  ;;  %s717_s28 = scalar_lea.sflag [#allocation5], %s716_s20 }
 0x23f   : > { %p820_p3 = pnand %p1422_p7, %p1421_p0 }
 0x241   : > { %p821_p8 = pneg %p820_p3 }
 0x243   : > { %965 = dma.done.wait (%p821_p8), %s717_s28, 32  }
 0x244   : > { %967 = vsyncadd (%p821_p8), %s717_s28, 4294967264  ;;  %p18_p9 = scmp.ge.s32.totalorder %s1038_s19, 4   ;;  %s1423_s14 = smov %s974_s15 }
 0x245   : > { %s1424_s15 = smov %s978_s16  ;;  %s1425_s16 = smov %s1050_s22 }
 0x246   : > { %s1426_s17 = smov %s1038_s19  ;;  %20 = sbr.rel (!%p18_p9) target bundleno = 8 (0x8), region = 81 }
 0x24b   :  { %722 = vsyncpa [#allocation4], 1 }
 0x24c   :  { %724 = vsyncpa [#allocation4 + $0x1], 1 }
 0x24d   :  { %725 = vsyncpa [#allocation7], 1 }
 0x24e   :  { %726 = vsyncpa [#allocation5], 1 }
 0x24f   :  { %728 = vsyncpa [#allocation5 + $0x1], 1 }

</bundles_post_ra>
